<compile_context>
chip_gen: v5e
topology: v5e:2x2
jax: 0.10.0
libtpu: 0.0.40
codegen_flags: <defaults>
</compile_context>

<pallas_src>
import jax
import jax.numpy as jnp
from jax.experimental import pallas as pl
from jax.experimental.pallas import tpu as pltpu

IN_F = 150
HID_F = 50
OUT_F = 10
TB_DEFAULT = 8192          # rows per batch tile (multiple of 128)
_LANE = 128


def _round_up(n, m):
    return (n + m - 1) // m * m


def _make_kernel(tb, n_valid_rows):
    """Kernel closure over static tile size and true (unpadded) batch size."""

    def kernel(x_ref, w1_ref, b1_ref, w2_ref, b2_ref, t_ref, out_ref, sq_ref):
        i = pl.program_id(0)

        # fc1: (tb,150)bf16 @ (150,50)bf16 -> f32 acc; bias + sigmoid in f32
        h = jnp.dot(x_ref[...], w1_ref[...], preferred_element_type=jnp.float32)
        h = jax.nn.sigmoid(h + b1_ref[...])                      # (tb,50) f32

        # fc2: (tb,50)bf16 @ (50,10)bf16 -> f32 acc; bias in f32
        y = jnp.dot(h.astype(jnp.bfloat16), w2_ref[...],
                    preferred_element_type=jnp.float32)
        y = y + b2_ref[...]                                      # (tb,10) f32

        # lane-dense epilogue: one small XLU transpose, reused for store + loss
        y_t = y.T                                                # (10, tb) f32
        out_ref[...] = y_t.astype(out_ref.dtype)                 # full-width bf16 stores

        # per-tile partial sum of squares; batch-padding columns masked out
        col = i * tb + jax.lax.broadcasted_iota(jnp.int32, (1, tb), 1)
        valid = (col < n_valid_rows).astype(jnp.float32)         # (1, tb)
        diff = (y_t - t_ref[...].astype(jnp.float32)) * valid    # (10, tb) f32
        s = jnp.sum(diff * diff)                                 # scalar f32
        # disjoint lane-dense (8,128) block per tile -> race-free under "parallel"
        sq_ref[...] = jnp.full((8, 128), s, dtype=jnp.float32)

    return kernel


def prepare_params(w1, b1, w2, b2):
    """Hoisted one-time transform: pre-transposed bf16 weights, f32 row biases."""
    return (
        w1.T.astype(jnp.bfloat16),               # (150, 50)
        b1.reshape(1, HID_F).astype(jnp.float32),
        w2.T.astype(jnp.bfloat16),               # (50, 10)
        b2.reshape(1, OUT_F).astype(jnp.float32),
    )


def prepare_x(x):
    """Optional one-time cast; reuse the result across calls so the wrapper never
    re-reads/re-writes x in HBM (and pick B as a multiple of the tile size)."""
    return x.reshape(-1, IN_F).astype(jnp.bfloat16)


def mlpnet_forward(x, target, params, *, tb=TB_DEFAULT):
    """x: anything reshaping to (-1,150); target: (B,10).
    Returns (logits (B,10) bf16, loss scalar f32) matching the PyTorch module."""
    w1_t, b1_r, w2_t, b2_r = params

    x = x.reshape(-1, IN_F)
    B = x.shape[0]

    # tile size: multiple of 128 (lane-dense target/logits blocks), clamped to batch
    tb = min(_round_up(max(int(tb), _LANE), _LANE), _round_up(B, _LANE))
    b_pad = _round_up(B, tb)
    num_tiles = b_pad // tb

    # x: avoid the extra HBM pass when already bf16 and no padding is needed
    if x.dtype != jnp.bfloat16:
        x = x.astype(jnp.bfloat16)
    if b_pad != B:
        x = jnp.pad(x, ((0, b_pad - B), (0, 0)))

    # target: lane-dense (10, b_pad) bf16 (tiny array, cheap wrapper transform)
    t_t = target.reshape(B, OUT_F).T.astype(jnp.bfloat16)
    if b_pad != B:
        t_t = jnp.pad(t_t, ((0, 0), (0, b_pad - B)))

    kernel = _make_kernel(tb, B)

    out_t, sq = pl.pallas_call(
        kernel,
        grid=(num_tiles,),
        in_specs=[
            pl.BlockSpec((tb, IN_F), lambda i: (i, 0)),       # x tile (streamed)
            pl.BlockSpec((IN_F, HID_F), lambda i: (0, 0)),    # w1 (resident)
            pl.BlockSpec((1, HID_F), lambda i: (0, 0)),       # b1 (resident)
            pl.BlockSpec((HID_F, OUT_F), lambda i: (0, 0)),   # w2 (resident)
            pl.BlockSpec((1, OUT_F), lambda i: (0, 0)),       # b2 (resident)
            pl.BlockSpec((OUT_F, tb), lambda i: (0, i)),      # target tile (lane-dense)
        ],
        out_specs=(
            pl.BlockSpec((OUT_F, tb), lambda i: (0, i)),      # logits.T tile (lane-dense)
            pl.BlockSpec((8, 128), lambda i: (i, 0)),         # per-tile partial sumsq
        ),
        out_shape=(
            jax.ShapeDtypeStruct((OUT_F, b_pad), jnp.bfloat16),
            jax.ShapeDtypeStruct((num_tiles * 8, 128), jnp.float32),
        ),
        compiler_params=pltpu.CompilerParams(
            dimension_semantics=("parallel",),
            vmem_limit_bytes=48 * 1024 * 1024,
        ),
        cost_estimate=pl.CostEstimate(
            flops=2 * b_pad * (IN_F * HID_F + HID_F * OUT_F),
            transcendentals=b_pad * HID_F,
            bytes_accessed=b_pad * (IN_F * 2 + OUT_F * 2 + OUT_F * 2)
            + num_tiles * 8 * 128 * 4
            + IN_F * HID_F * 2 + HID_F * OUT_F * 2 + (HID_F + OUT_F) * 4,
        ),
    )(x, w1_t, b1_r, w2_t, b2_r, t_t)

    sumsq = jnp.sum(sq[::8, 0])              # one scalar per tile
    loss = jnp.sqrt(sumsq)                   # torch.dist(y, target, 2)
    logits = out_t[:, :B].T                  # (B, 10) bf16
    return logits, loss


def init_params(key):
    """Deterministic init mimicking nn.Linear default (uniform +-1/sqrt(fan_in))."""
    k1, k2, k3, k4 = jax.random.split(key, 4)
    bound1 = 1.0 / jnp.sqrt(float(IN_F))
    bound2 = 1.0 / jnp.sqrt(float(HID_F))
    w1 = jax.random.uniform(k1, (HID_F, IN_F), jnp.float32, -bound1, bound1)
    b1 = jax.random.uniform(k2, (HID_F,), jnp.float32, -bound1, bound1)
    w2 = jax.random.uniform(k3, (OUT_F, HID_F), jnp.float32, -bound2, bound2)
    b2 = jax.random.uniform(k4, (OUT_F,), jnp.float32, -bound2, bound2)
    return w1, b1, w2, b2


def _reference(x, target, w1, b1, w2, b2):
    h = jax.nn.sigmoid(x.reshape(-1, IN_F) @ w1.T + b1)
    y = h @ w2.T + b2
    loss = jnp.sqrt(jnp.sum((y - target) ** 2))
    return y, loss


if __name__ == "__main__":
    key = jax.random.PRNGKey(0)
    kx, kt, kp, kx2, kt2, kx3, kt3 = jax.random.split(key, 7)

    w1, b1, w2, b2 = init_params(kp)
    params = prepare_params(w1, b1, w2, b2)          # hoisted, reused across calls

    forward = jax.jit(mlpnet_forward, static_argnames=("tb",))

    # --- small batch: single 128-row tile, 120 padded rows masked ---
    B = 8
    x = jax.random.normal(kx, (B, IN_F), jnp.float32)
    target = jax.random.normal(kt, (B, OUT_F), jnp.float32)
    out, loss = forward(x, target, params)
    jax.block_until_ready((out, loss))
    y_ref, loss_ref = _reference(x, target, w1, b1, w2, b2)
    assert out.shape == (B, OUT_F)
    assert jnp.allclose(out.astype(jnp.float32), y_ref, atol=2e-2, rtol=2e-2), "logits mismatch (B=8)"
    assert jnp.allclose(loss, loss_ref, atol=2e-2, rtol=2e-2), "loss mismatch (B=8)"

    # --- multi-tile path with padding/masking (B=300, tb=128 -> 3 tiles) ---
    B2 = 300
    x2 = jax.random.normal(kx2, (B2, IN_F), jnp.float32)
    target2 = jax.random.normal(kt2, (B2, OUT_F), jnp.float32)
    out2, loss2 = forward(x2, target2, params, tb=128)
    jax.block_until_ready((out2, loss2))
    y_ref2, loss_ref2 = _reference(x2, target2, w1, b1, w2, b2)
    assert out2.shape == (B2, OUT_F)
    assert jnp.allclose(out2.astype(jnp.float32), y_ref2, atol=2e-2, rtol=2e-2), "logits mismatch (B=300)"
    assert jnp.allclose(loss2, loss_ref2, atol=2e-2, rtol=2e-2), "loss mismatch (B=300)"

    # --- zero-copy x path: pre-cast bf16 x, B % tb == 0 (no wrapper pad/cast) ---
    B3 = 512
    x3 = prepare_x(jax.random.normal(kx3, (B3, IN_F), jnp.float32))
    target3 = jax.random.normal(kt3, (B3, OUT_F), jnp.float32)
    out3, loss3 = forward(x3, target3, params)
    jax.block_until_ready((out3, loss3))
    y_ref3, loss_ref3 = _reference(x3.astype(jnp.float32), target3, w1, b1, w2, b2)
    assert out3.shape == (B3, OUT_F)
    assert jnp.allclose(out3.astype(jnp.float32), y_ref3, atol=2e-2, rtol=2e-2), "logits mismatch (B=512)"
    assert jnp.allclose(loss3, loss_ref3, atol=2e-2, rtol=2e-2), "loss mismatch (B=512)"

    print("KERNEL_OK")
</pallas_src>

<mosaic_0001>
module attributes {stable_mosaic.version = 11 : i64} {
  func.func @kernel(%arg0: i32, %arg1: memref<128x150xbf16, #tpu.memory_space<vmem>>, %arg2: memref<150x50xbf16, #tpu.memory_space<vmem>>, %arg3: memref<1x50xf32, #tpu.memory_space<vmem>>, %arg4: memref<50x10xbf16, #tpu.memory_space<vmem>>, %arg5: memref<1x10xf32, #tpu.memory_space<vmem>>, %arg6: memref<10x128xbf16, #tpu.memory_space<vmem>>, %arg7: memref<10x128xbf16, #tpu.memory_space<vmem>>, %arg8: memref<8x128xf32, #tpu.memory_space<vmem>>) attributes {dimension_semantics = [#tpu.dimension_semantics<parallel>], iteration_bounds = array<i64: 1>, scalar_prefetch = 0 : i64, scratch_operands = 0 : i64, tpu.core_type = #tpu.core_type<tc>, window_params = [{transform_indices = @transform_0, window_bounds = array<i64: 128, 150>}, {pipeline_mode = #tpu.pipeline_mode<synchronous>, transform_indices = @transform_1, window_bounds = array<i64: 150, 50>}, {pipeline_mode = #tpu.pipeline_mode<synchronous>, transform_indices = @transform_2, window_bounds = array<i64: 1, 50>}, {pipeline_mode = #tpu.pipeline_mode<synchronous>, transform_indices = @transform_3, window_bounds = array<i64: 50, 10>}, {pipeline_mode = #tpu.pipeline_mode<synchronous>, transform_indices = @transform_4, window_bounds = array<i64: 1, 10>}, {transform_indices = @transform_5, window_bounds = array<i64: 10, 128>}, {transform_indices = @transform_6, window_bounds = array<i64: 10, 128>}, {transform_indices = @transform_7, window_bounds = array<i64: 8, 128>}]} {
    %c0 = arith.constant 0 : index
    %c0_0 = arith.constant 0 : index
    %0 = vector.load %arg1[%c0, %c0_0] : memref<128x150xbf16, #tpu.memory_space<vmem>>, vector<128x150xbf16>
    %c0_1 = arith.constant 0 : index
    %c0_2 = arith.constant 0 : index
    %1 = vector.load %arg2[%c0_1, %c0_2] : memref<150x50xbf16, #tpu.memory_space<vmem>>, vector<150x50xbf16>
    %cst = arith.constant dense<0.000000e+00> : vector<128x50xf32>
    %2 = tpu.matmul %0, %1, %cst {dimension_numbers = #tpu.dot_dimension_numbers<[1], [0], [0], [1], [0, 0, 1, 1], [], []>} : vector<128x150xbf16>, vector<150x50xbf16>, vector<128x50xf32> -> vector<128x50xf32>
    %c0_3 = arith.constant 0 : index
    %c0_4 = arith.constant 0 : index
    %3 = vector.load %arg3[%c0_3, %c0_4] : memref<1x50xf32, #tpu.memory_space<vmem>>, vector<1x50xf32>
    %4 = vector.broadcast %3 : vector<1x50xf32> to vector<128x50xf32>
    %5 = arith.addf %2, %4 : vector<128x50xf32>
    %6 = arith.negf %5 : vector<128x50xf32>
    %7 = math.exp %6 : vector<128x50xf32>
    %cst_5 = arith.constant 1.000000e+00 : f32
    %8 = vector.broadcast %cst_5 : f32 to vector<128x50xf32>
    %9 = arith.addf %8, %7 : vector<128x50xf32>
    %10 = arith.divf %8, %9 : vector<128x50xf32>
    %11 = arith.truncf %10 : vector<128x50xf32> to vector<128x50xbf16>
    %c0_6 = arith.constant 0 : index
    %c0_7 = arith.constant 0 : index
    %12 = vector.load %arg4[%c0_6, %c0_7] : memref<50x10xbf16, #tpu.memory_space<vmem>>, vector<50x10xbf16>
    %cst_8 = arith.constant dense<0.000000e+00> : vector<128x10xf32>
    %13 = tpu.matmul %11, %12, %cst_8 {dimension_numbers = #tpu.dot_dimension_numbers<[1], [0], [0], [1], [0, 0, 1, 1], [], []>} : vector<128x50xbf16>, vector<50x10xbf16>, vector<128x10xf32> -> vector<128x10xf32>
    %c0_9 = arith.constant 0 : index
    %c0_10 = arith.constant 0 : index
    %14 = vector.load %arg5[%c0_9, %c0_10] : memref<1x10xf32, #tpu.memory_space<vmem>>, vector<1x10xf32>
    %15 = vector.broadcast %14 : vector<1x10xf32> to vector<128x10xf32>
    %16 = arith.addf %13, %15 : vector<128x10xf32>
    %17 = tpu.transpose %16, [1, 0] : vector<128x10xf32> -> vector<10x128xf32>
    %18 = arith.truncf %17 : vector<10x128xf32> to vector<10x128xbf16>
    %c0_11 = arith.constant 0 : index
    %c0_12 = arith.constant 0 : index
    %19 = vector.load %arg7[%c0_11, %c0_12] : memref<10x128xbf16, #tpu.memory_space<vmem>>, vector<10x128xbf16>
    tpu.vector_store %arg7[%c0_11, %c0_12], %18 {strides = array<i32>} : memref<10x128xbf16, #tpu.memory_space<vmem>>, vector<10x128xbf16>,
    %c128_i32 = arith.constant 128 : i32
    %20 = arith.muli %arg0, %c128_i32 : i32
    %21 = tpu.iota {dimensions = array<i32: 1>} : vector<1x128xi32>
    %22 = vector.broadcast %20 : i32 to vector<1x128xi32>
    %23 = arith.addi %22, %21 : vector<1x128xi32>
    %c8_i32 = arith.constant 8 : i32
    %24 = vector.broadcast %c8_i32 : i32 to vector<1x128xi32>
    %25 = arith.cmpi slt, %23, %24 : vector<1x128xi32>
    %26 = arith.extui %25 : vector<1x128xi1> to vector<1x128xi32>
    %27 = arith.sitofp %26 : vector<1x128xi32> to vector<1x128xf32>
    %c0_13 = arith.constant 0 : index
    %c0_14 = arith.constant 0 : index
    %28 = vector.load %arg6[%c0_13, %c0_14] : memref<10x128xbf16, #tpu.memory_space<vmem>>, vector<10x128xbf16>
    %29 = arith.extf %28 : vector<10x128xbf16> to vector<10x128xf32>
    %30 = arith.subf %17, %29 : vector<10x128xf32>
    %31 = vector.broadcast %27 : vector<1x128xf32> to vector<10x128xf32>
    %32 = arith.mulf %30, %31 : vector<10x128xf32>
    %33 = arith.mulf %32, %32 : vector<10x128xf32>
    %34 = vector.shape_cast %33 : vector<10x128xf32> to vector<1x10x128xf32>
    %cst_15 = arith.constant dense<0.000000e+00> : vector<1xf32>
    %35 = vector.multi_reduction <add>, %34, %cst_15 [1, 2] : vector<1x10x128xf32> to vector<1xf32>
    %36 = vector.shape_cast %35 : vector<1xf32> to vector<1x1x1xf32>
    %37 = vector.extract %36[0, 0, 0] : f32 from vector<1x1x1xf32>
    %38 = vector.broadcast %37 : f32 to vector<8x128xf32>
    %c0_16 = arith.constant 0 : index
    %c0_17 = arith.constant 0 : index
    %39 = vector.load %arg8[%c0_16, %c0_17] : memref<8x128xf32, #tpu.memory_space<vmem>>, vector<8x128xf32>
    tpu.vector_store %arg8[%c0_16, %c0_17], %38 {strides = array<i32>} : memref<8x128xf32, #tpu.memory_space<vmem>>, vector<8x128xf32>,
    return
  }
  func.func @transform_0(%arg0: i32) -> (i32, i32) {
    %c0_i32 = arith.constant 0 : i32
    %c0_i32_0 = arith.constant 0 : i32
    return %arg0, %c0_i32 : i32, i32
  }
  func.func @transform_1(%arg0: i32) -> (i32, i32) {
    %c0_i32 = arith.constant 0 : i32
    %c0_i32_0 = arith.constant 0 : i32
    %c0_i32_1 = arith.constant 0 : i32
    return %c0_i32, %c0_i32_0 : i32, i32
  }
  func.func @transform_2(%arg0: i32) -> (i32, i32) {
    %c0_i32 = arith.constant 0 : i32
    %c0_i32_0 = arith.constant 0 : i32
    %c0_i32_1 = arith.constant 0 : i32
    return %c0_i32, %c0_i32_0 : i32, i32
  }
  func.func @transform_3(%arg0: i32) -> (i32, i32) {
    %c0_i32 = arith.constant 0 : i32
    %c0_i32_0 = arith.constant 0 : i32
    %c0_i32_1 = arith.constant 0 : i32
    return %c0_i32, %c0_i32_0 : i32, i32
  }
  func.func @transform_4(%arg0: i32) -> (i32, i32) {
    %c0_i32 = arith.constant 0 : i32
    %c0_i32_0 = arith.constant 0 : i32
    %c0_i32_1 = arith.constant 0 : i32
    return %c0_i32, %c0_i32_0 : i32, i32
  }
  func.func @transform_5(%arg0: i32) -> (i32, i32) {
    %c0_i32 = arith.constant 0 : i32
    %c0_i32_0 = arith.constant 0 : i32
    return %c0_i32, %arg0 : i32, i32
  }
  func.func @transform_6(%arg0: i32) -> (i32, i32) {
    %c0_i32 = arith.constant 0 : i32
    %c0_i32_0 = arith.constant 0 : i32
    return %c0_i32, %arg0 : i32, i32
  }
  func.func @transform_7(%arg0: i32) -> (i32, i32) {
    %c0_i32 = arith.constant 0 : i32
    %c0_i32_0 = arith.constant 0 : i32
    return %arg0, %c0_i32 : i32, i32
  }
}

</mosaic_0001>

<bundles_post_ra>
// kernel: mlpnet_forward.1
= control target key start
LH: loop header
LB: loop body
LE: loop exit
PB: predicated region body
PF: predicated region fallthrough
CT: control target
= control target key end

     0   :  { %vm219_vm0 = vcmask 1042432   ;;  %vm194_vm1 = vcmask 179200   ;;  %vm690_vm2 = vcmask 1040384   ;;  %vm665_vm11 = vcmask 408576   ;;  %s1561_s1 = inlined_call_operand.vmem [shape: bf16[150,50], index: 1, kind: input, shape index: {}]   ;;  %s1562_s0 = inlined_call_operand.vmem [shape: bf16[128,150], index: 0, kind: input, shape index: {}]   ;;  %s1563_s2 = inlined_call_operand.vmem [shape: f32[1,50], index: 2, kind: input, shape index: {}]   ;;  %s1564_s3 = inlined_call_operand.vmem [shape: bf16[50,10], index: 3, kind: input, shape index: {}]   ;;  %s1565_s4 = inlined_call_operand.vmem [shape: f32[1,10], index: 4, kind: input, shape index: {}]   ;;  %s1566_s5 = inlined_call_operand.vmem [shape: bf16[10,128], index: 5, kind: input, shape index: {}]   ;;  %s1567_s6 = inlined_call_operand.vmem [shape: bf16[10,128], index: 6, kind: output, shape index: {0}]   ;;  %s1568_s7 = inlined_call_operand.vmem [shape: f32[8,128], index: 7, kind: output, shape index: {1}]  }
   0x1   :  { %v987_v0 = vld [vmem:[%s1561_s1 + $0x38] sm:$0xff]  ;;  %v60_v1 = vld [vmem:[%s1561_s1 + $0x48] sm:$0x7]  ;;  %v986_v3 = vld [vmem:[%s1561_s1 + $0x30] sm:$0xff] }
   0x2   :  { %v174_v2 = vunpack.c.l.b16 %v60_v1  ;;  %223 = vmatpush.bf16.msra.mxu0 %v987_v0  ;;  %992 = vmatpush.bf16.msra.mxu3 %v987_v0  ;;  %v988_v6 = vld [vmem:[%s1561_s1 + $0x40] sm:$0xff]  ;;  %v985_v7 = vld [vmem:[%s1561_s1 + $0x28] sm:$0xff]  ;;  %v983_v12 = vld [vmem:[%s1561_s1 + $0x18] sm:$0xff] }
   0x3   :  { %v964_v8 = vld [vmem:[%s1562_s0 + $0x4] sm:$0xf]  ;;  %v823_v9 = vld [vmem:[%s1562_s0 + $0x8] sm:$0xf0]  ;;  %v982_v13 = vld [vmem:[%s1561_s1 + $0x10] sm:$0xff] }
   0x4   :  { %v184_v4 = vpack.c.b16 %v174_v2, %v174_v2  ;;  %v826_v10 = vor.u32 %v964_v8, %v823_v9  ;;  %v984_v11 = vld [vmem:[%s1561_s1 + $0x20] sm:$0xff]  ;;  %v981_v14 = vld [vmem:[%s1561_s1 + $0x8] sm:$0xff]  ;;  %v966_v15 = vld [vmem:[%s1562_s0 + $0x14] sm:$0xf] }
   0x5   :  { %v831_v16 = vld [vmem:[%s1562_s0 + $0x18] sm:$0xf0]  ;;  %v980_v18 = vld [vmem:[%s1561_s1] sm:$0xff]  ;;  %v965_v20 = vld [vmem:[%s1562_s0 + $0x4] sm:$0xf0] }
   0x6   :  { %v221_v5 = vsel %vm219_vm0, %v184_v4, 0  ;;  %224 = vmatpush.bf16.msra.mxu0 %v986_v3  ;;  %993 = vmatpush.bf16.msra.mxu3 %v986_v3  ;;  %v834_v17 = vor.u32 %v966_v15, %v831_v16  ;;  %v821_v19 = vld [vmem:[%s1562_s0] sm:$0xf]  ;;  %v977_v23 = vld [vmem:[%s1562_s0 + $0x64] sm:$0xf0] }
   0x7   :  { %278 = vmatpush.bf16.msra.mxu1 %v221_v5  ;;  %v822_v21 = vor.u32 %v965_v20, %v821_v19  ;;  %v869_v22 = vld [vmem:[%s1562_s0 + $0x60] sm:$0xf]  ;;  %v968_v25 = vld [vmem:[%s1562_s0 + $0x24] sm:$0xf]  ;;  %v839_v26 = vld [vmem:[%s1562_s0 + $0x28] sm:$0xf0] }
   0x8   :  { %v870_v24 = vor.u32 %v977_v23, %v869_v22  ;;  %v842_v27 = vor.u32 %v968_v25, %v839_v26  ;;  %v829_v28 = vld [vmem:[%s1562_s0 + $0x10] sm:$0xf]  ;;  %v967_v29 = vld [vmem:[%s1562_s0 + $0x14] sm:$0xf0]  ;;  %v970_v34 = vld [vmem:[%s1562_s0 + $0x34] sm:$0xf] }
   0x9   :  { %v830_v30 = vor.u32 %v967_v29, %v829_v28  ;;  %v877_v31 = vld [vmem:[%s1562_s0 + $0x70] sm:$0xf]  ;;  %v979_v32 = vld [vmem:[%s1562_s0 + $0x74] sm:$0xf0]  ;;  %v847_v35 = vld [vmem:[%s1562_s0 + $0x38] sm:$0xf0] }
   0xa   :  { %225 = vmatpush.bf16.msra.mxu0 %v985_v7  ;;  %994 = vmatpush.bf16.msra.mxu3 %v985_v7  ;;  %v878_v33 = vor.u32 %v979_v32, %v877_v31  ;;  %v850_v36 = vor.u32 %v970_v34, %v847_v35  ;;  %v837_v37 = vld [vmem:[%s1562_s0 + $0x20] sm:$0xf]  ;;  %v969_v38 = vld [vmem:[%s1562_s0 + $0x24] sm:$0xf0]  ;;  %v978_v40 = vld [vmem:[%s1562_s0 + $0x74] sm:$0xf] }
   0xb   :  { %279 = vmatpush.bf16.msra.mxu1 %v988_v6  ;;  %v838_v39 = vor.u32 %v969_v38, %v837_v37  ;;  %v879_v41 = vld [vmem:[%s1562_s0 + $0x78] sm:$0xf0]  ;;  %v972_v43 = vld [vmem:[%s1562_s0 + $0x44] sm:$0xf]  ;;  %v855_v44 = vld [vmem:[%s1562_s0 + $0x48] sm:$0xf0] }
   0xc   :  { %v882_v42 = vor.u32 %v978_v40, %v879_v41  ;;  %v858_v45 = vor.u32 %v972_v43, %v855_v44  ;;  %v845_v46 = vld [vmem:[%s1562_s0 + $0x30] sm:$0xf]  ;;  %v971_v47 = vld [vmem:[%s1562_s0 + $0x34] sm:$0xf0]  ;;  %v974_v49 = vld [vmem:[%s1562_s0 + $0x54] sm:$0xf] }
   0xd   :  { %v846_v48 = vor.u32 %v971_v47, %v845_v46  ;;  %v863_v50 = vld [vmem:[%s1562_s0 + $0x58] sm:$0xf0]  ;;  %v853_v52 = vld [vmem:[%s1562_s0 + $0x40] sm:$0xf]  ;;  %v973_v53 = vld [vmem:[%s1562_s0 + $0x44] sm:$0xf0] }
   0xe   :  { %919 = vmatmul.msk.bf16.vlgmr.msra.gmra.mxu1 %vm194_vm1, %v826_v10  ;;  %226 = vmatpush.bf16.msra.mxu0 %v984_v11  ;;  %v866_v51 = vor.u32 %v974_v49, %v863_v50  ;;  %v854_v54 = vor.u32 %v973_v53, %v853_v52  ;;  %v976_v55 = vld [vmem:[%s1562_s0 + $0x64] sm:$0xf]  ;;  %v871_v56 = vld [vmem:[%s1562_s0 + $0x68] sm:$0xf0]  ;;  %v861_v58 = vld [vmem:[%s1562_s0 + $0x50] sm:$0xf] }
   0xf   :  { %995 = vmatpush.bf16.msra.mxu3 %v984_v11  ;;  %v874_v57 = vor.u32 %v976_v55, %v871_v56  ;;  %v975_v59 = vld [vmem:[%s1562_s0 + $0x54] sm:$0xf0]  ;;  %v1256_v4 = vld [vmem:[%s1563_s2] ss:$0 sm:$0xff]  ;;  %v990_v8 = vld [vmem:[%s1564_s3 + $0x8] sm:$0xff] }
  0x10   :  { %v862_v60 = vor.u32 %v975_v59, %v861_v58  ;;  %v639_v63 = vld [vmem:[%s1564_s3 + $0x18] sm:$0x1] }
  0x11   :  { %v657_v0 = vunpack.c.l.b16 %v639_v63 }
  0x12   :  { %227 = vmatpush.bf16.msra.mxu0 %v983_v12 }
  0x13   :  { %996 = vmatpush.bf16.msra.mxu3 %v983_v12  ;;  %v661_v1 = vpack.c.b16 %v657_v0, %v657_v0  ;;  %v989_v12 = vld [vmem:[%s1564_s3] sm:$0xff] }
  0x15   :  { %v692_v2 = vsel %vm690_vm2, %v661_v1, 0 }
  0x16   :  { %228 = vmatpush.bf16.msra.mxu0 %v982_v13  ;;  %698 = vmatpush.bf16.msra.mxu2 %v692_v2 }
  0x17   :  { %997 = vmatpush.bf16.msra.mxu3 %v982_v13 }
  0x1a   :  { %229 = vmatpush.bf16.msra.mxu0 %v981_v14 }
  0x1b   :  { %998 = vmatpush.bf16.msra.mxu3 %v981_v14 }
  0x1e   :  { %920 = vmatmul.msk.bf16.gmra.mxu1 %vm194_vm1, %v834_v17  ;;  %230 = vmatpush.bf16.msra.mxu0 %v980_v18 }
  0x1f   :  { %999 = vmatpush.bf16.msra.mxu3 %v980_v18 }
  0x21   :  { %231 = vmatmul.bf16.vlgmr.msra.gmra.mxu0 %v822_v21 }
  0x22   :  { %261 = vmatmul.bf16.vlgmr.msra.gmra.mxu3 %v870_v24 }
  0x23   :  { %1000 = vmatpush.bf16.msrb.mxu3 %v221_v5  ;;  %v991_v5 = vld [vmem:[%s1564_s3 + $0x10] sm:$0xff] }
  0x24   :  { %699 = vmatpush.bf16.msra.mxu2 %v991_v5 }
  0x27   :  { %1001 = vmatpush.bf16.msrb.mxu3 %v988_v6 }
  0x28   :  { %700 = vmatpush.bf16.msra.mxu2 %v990_v8 }
  0x2b   :  { %1002 = vmatpush.bf16.msra.mxu3 %v692_v2 }
  0x2c   :  { %701 = vmatpush.bf16.msra.mxu2 %v989_v12 }
  0x2e   :  { %921 = vmatmul.msk.bf16.gmra.mxu1 %vm194_vm1, %v842_v27 }
  0x2f   :  { %1003 = vmatpush.bf16.msra.mxu3 %v991_v5 }
  0x31   :  { %236 = vmatmul.bf16.gmra.mxu0 %v830_v30 }
  0x32   :  { %266 = vmatmul.bf16.gmra.mxu3 %v878_v33 }
  0x33   :  { %1004 = vmatpush.bf16.msra.mxu3 %v990_v8 }
  0x37   :  { %1005 = vmatpush.bf16.msra.mxu3 %v989_v12 }
  0x3e   :  { %922 = vmatmul.msk.bf16.gmra.mxu1 %vm194_vm1, %v850_v36 }
  0x41   :  { %241 = vmatmul.bf16.gmra.mxu0 %v838_v39 }
  0x42   :  { %926 = vmatmul.msk.bf16.vlgmr.msrb.gmra.mxu3 %vm194_vm1, %v882_v42 }
  0x4e   :  { %923 = vmatmul.msk.bf16.gmra.mxu1 %vm194_vm1, %v858_v45 }
  0x51   :  { %246 = vmatmul.bf16.gmra.mxu0 %v846_v48 }
  0x5e   :  { %924 = vmatmul.msk.bf16.gmra.mxu1 %vm194_vm1, %v866_v51 }
  0x61   :  { %251 = vmatmul.bf16.gmra.mxu0 %v854_v54 }
  0x6e   :  { %925 = vmatmul.msk.bf16.gmra.mxu1 %vm194_vm1, %v874_v57 }
  0x71   :  { %256 = vmatmul.bf16.gmra.mxu0 %v862_v60 }
  0x8b   :  { %v281_v61 = vpop.f32.mrf.mxu1 }
  0x93   :  { %v283_v62 = vpop.f32.mrf.mxu1 }
  0x9b   :  { %v286_v3 = vpop.f32.mrf.mxu1 }
  0x9e   :  { %v232_v6 = vpop.f32.mrf.mxu0 }
  0x9f   :  { %v233_v7 = vadd.f32 %v1256_v4, %v232_v6 }
  0xa1   :  { %v282_v9 = vadd.f32 %v281_v61, %v233_v7 }
  0xa3   :  { %v288_v10 = vpop.f32.mrf.mxu1  ;;  %v927_v11 = vmul.f32 -1.442695, %v282_v9 }
  0xa5   :  { %1011 = vpow2.f32 %v927_v11  ;;  %v1268_v13 = vpop.f32.mrf.mxu3 }
  0xa6   :  { %v234_v14 = vpop.f32.mrf.mxu0 }
  0xa7   :  { %v235_v15 = vadd.f32 %v1256_v4, %v234_v14 }
  0xa9   :  { %v284_v16 = vadd.f32 %v283_v62, %v235_v15 }
  0xab   :  { %v291_v17 = vpop.f32.mrf.mxu1  ;;  %v1012_v18 = vpop.eup %1011  ;;  %v928_v19 = vmul.f32 -1.442695, %v284_v16 }
  0xac   :  { %v369_v20 = vadd.f32 1.0, %v1012_v18 }
  0xad   :  { %1013 = vpow2.f32 %v928_v19  ;;  %v1271_v22 = vpop.f32.mrf.mxu3 }
  0xae   :  { %1015 = vrcp.f32 %v369_v20  ;;  %v237_v21 = vpop.f32.mrf.mxu0  ;;  %vm390_vm4 = vweird.f32 %v369_v20  ;;  %v394_v48 = vand.u32 2147483647, %v369_v20  ;;  %v396_v49 = vand.u32 2147483648, %v369_v20 }
  0xaf   :  { %v238_v23 = vadd.f32 %v1256_v4, %v237_v21 }
  0xb0   :  { %vm395_vm8 = vcmp.eq.f32.partialorder %v394_v48, 8.507059e+37  ;;  %v397_v62 = vor.u32 1.1754944e-38, %v396_v49 }
  0xb1   :  { %v287_v24 = vadd.f32 %v286_v3, %v238_v23 }
  0xb3   :  { %v293_v25 = vpop.f32.mrf.mxu1  ;;  %v1014_v26 = vpop.eup %1013  ;;  %v929_v27 = vmul.f32 -1.442695, %v287_v24 }
  0xb4   :  { %v1016_v28 = vpop.eup %1015  ;;  %v370_v29 = vadd.f32 1.0, %v1014_v26 }
  0xb5   :  { %1017 = vpow2.f32 %v929_v27  ;;  %v386_v30 = vmul.f32 %v1016_v28, %v369_v20  ;;  %v267_v32 = vpop.f32.mrf.mxu3  ;;  %vm391_vm3 = vweird.f32 %v1016_v28 }
  0xb6   :  { %1019 = vrcp.f32 %v370_v29  ;;  %v239_v31 = vpop.f32.mrf.mxu0  ;;  %v411_v50 = vand.u32 2147483648, %v370_v29  ;;  %v409_v53 = vand.u32 2147483647, %v370_v29  ;;  %vm1283_vm6 = vmor %vm390_vm4, %vm391_vm3  ;;  %vm405_vm7 = vweird.f32 %v370_v29 }
  0xb7   :  { %v240_v33 = vadd.f32 %v1256_v4, %v239_v31  ;;  %v387_v34 = vsub.f32 1.0, %v386_v30  ;;  %v268_v12 = vadd.f32 %v1256_v4, %v267_v32 }
  0xb8   :  { %v412_v63 = vor.u32 1.1754944e-38, %v411_v50  ;;  %vm410_vm10 = vcmp.eq.f32.partialorder %v409_v53, 8.507059e+37 }
  0xb9   :  { %v289_v35 = vadd.f32 %v288_v10, %v240_v33  ;;  %v388_v39 = vmul.f32 %v1016_v28, %v387_v34 }
  0xbb   :  { %v1275_v36 = vpop.f32.mrf.mxu1  ;;  %v1018_v37 = vpop.eup %1017  ;;  %v930_v38 = vmul.f32 -1.442695, %v289_v35  ;;  %v389_v46 = vadd.f32 %v1016_v28, %v388_v39 }
  0xbc   :  { %v1020_v40 = vpop.eup %1019  ;;  %v1277_v41 = vadd.f32 1.0, %v1018_v37 }
  0xbd   :  { %1021 = vpow2.f32 %v930_v38  ;;  %v401_v42 = vmul.f32 %v1020_v40, %v370_v29  ;;  %v269_v44 = vpop.f32.mrf.mxu3  ;;  %vm406_vm5 = vweird.f32 %v1020_v40  ;;  %v393_v58 = vsel %vm1283_vm6, %v1016_v28, %v389_v46 }
  0xbe   :  { %1023 = vrcp.f32 %v1277_v41  ;;  %v242_v43 = vpop.f32.mrf.mxu0  ;;  %vm407_vm9 = vmor %vm405_vm7, %vm406_vm5  ;;  %v398_v3 = vsel %vm395_vm8, %v397_v62, %v393_v58  ;;  %v270_v19 = vadd.f32 %v1256_v4, %v269_v44  ;;  %vm420_vm12 = vweird.f32 %v1277_v41 }
  0xbf   :  { %v243_v45 = vadd.f32 %v1256_v4, %v242_v43  ;;  %v402_v47 = vsub.f32 1.0, %v401_v42  ;;  %v424_v23 = vand.u32 2147483647, %v1277_v41  ;;  %v426_v29 = vand.u32 2147483648, %v1277_v41 }
  0xc1   :  { %v292_v51 = vadd.f32 %v291_v17, %v243_v45  ;;  %v403_v52 = vmul.f32 %v1020_v40, %v402_v47  ;;  %vm1324_vm0 = vcmp.eq.f32.partialorder %v424_v23, 8.507059e+37  ;;  %v427_v46 = vor.u32 1.1754944e-38, %v426_v29 }
  0xc3   :  { %v1281_v54 = vpop.f32.mrf.mxu1  ;;  %v1022_v56 = vpop.eup %1021  ;;  %v931_v57 = vmul.f32 -1.442695, %v292_v51  ;;  %v404_v59 = vadd.f32 %v1020_v40, %v403_v52 }
  0xc4   :  { %v1289_v60 = vpop.eup %1023  ;;  %v1291_v61 = vadd.f32 1.0, %v1022_v56 }
  0xc5   :  { %1025 = vpow2.f32 %v931_v57  ;;  %v408_v0 = vsel %vm407_vm9, %v1020_v40, %v404_v59  ;;  %v416_v1 = vmul.f32 %v1289_v60, %v1277_v41  ;;  %v316_v6 = vpop.f32.mrf.mxu3  ;;  %vm421_vm13 = vweird.f32 %v1289_v60 }
  0xc6   :  { %1027 = vrcp.f32 %v1291_v61  ;;  %v244_v2 = vpop.f32.mrf.mxu0  ;;  %v413_v5 = vsel %vm410_vm10, %v412_v63, %v408_v0  ;;  %v317_v24 = vadd.f32 %v316_v6, %v268_v12  ;;  %v441_v30 = vand.u32 2147483648, %v1291_v61  ;;  %vm1320_vm15 = vmor %vm420_vm12, %vm421_vm13 }
  0xc7   :  { %v245_v7 = vadd.f32 %v1256_v4, %v244_v2  ;;  %v625_v8 = vpack.c.bf16 %v413_v5, %v398_v3  ;;  %v417_v9 = vsub.f32 1.0, %v416_v1  ;;  %v439_v35 = vand.u32 2147483647, %v1291_v61 }
  0xc8   :  { %v941_v31 = vmul.f32 -1.442695, %v317_v24  ;;  %vm435_vm1 = vweird.f32 %v1291_v61  ;;  %v442_v47 = vor.u32 1.1754944e-38, %v441_v30 }
  0xc9   :  { %v294_v10 = vadd.f32 %v293_v25, %v245_v7  ;;  %955 = vmatmul.msk.bf16.vlgmr.msra.gmra.mxu2 %vm665_vm11, %v625_v8  ;;  %v418_v16 = vmul.f32 %v1289_v60, %v417_v9  ;;  %vm440_vm3 = vcmp.eq.f32.partialorder %v439_v35, 8.507059e+37 }
  0xcb   :  { %v1298_v11 = vpop.f32.mrf.mxu1  ;;  %v1026_v14 = vpop.eup %1025  ;;  %v932_v15 = vmul.f32 -1.442695, %v294_v10  ;;  %v419_v27 = vadd.f32 %v1289_v60, %v418_v16 }
  0xcc   :  { %v1028_v17 = vpop.eup %1027  ;;  %v1302_v18 = vadd.f32 1.0, %v1026_v14 }
  0xcd   :  { %1029 = vpow2.f32 %v932_v15  ;;  %v431_v20 = vmul.f32 %v1028_v17, %v1291_v61  ;;  %v318_v25 = vpop.f32.mrf.mxu3  ;;  %vm436_vm14 = vweird.f32 %v1028_v17  ;;  %v423_v43 = vsel %vm1320_vm15, %v1289_v60, %v419_v27 }
  0xce   :  { %1031 = vrcp.f32 %v1302_v18  ;;  %v247_v21 = vpop.f32.mrf.mxu0  ;;  %v319_v32 = vadd.f32 %v318_v25, %v270_v19  ;;  %vm437_vm2 = vmor %vm435_vm1, %vm436_vm14  ;;  %v428_v51 = vsel %vm1324_vm0, %v427_v46, %v423_v43  ;;  %v454_v3 = vand.u32 2147483647, %v1302_v18 }
  0xcf   :  { %v248_v26 = vadd.f32 %v1256_v4, %v247_v21  ;;  %v432_v28 = vsub.f32 1.0, %v431_v20  ;;  %1033 = vpow2.f32 %v941_v31  ;;  %vm450_vm5 = vweird.f32 %v1302_v18 }
  0xd0   :  { %v942_v40 = vmul.f32 -1.442695, %v319_v32  ;;  %v456_v8 = vand.u32 2147483648, %v1302_v18  ;;  %vm1370_vm7 = vcmp.eq.f32.partialorder %v454_v3, 8.507059e+37  ;;  %v263_v43 = vadd.f32 %v1256_v4, %v1268_v13 }
  0xd1   :  { %v297_v33 = vadd.f32 %v1275_v36, %v248_v26  ;;  %v433_v34 = vmul.f32 %v1028_v17, %v432_v28  ;;  %v265_v46 = vadd.f32 %v1256_v4, %v1271_v22 }
  0xd2   :  { %1035 = vpow2.f32 %v942_v40  ;;  %v457_v24 = vor.u32 1.1754944e-38, %v456_v8 }
  0xd3   :  { %v1316_v37 = vpop.f32.mrf.mxu1  ;;  %v1030_v42 = vpop.eup %1029  ;;  %v933_v36 = vmul.f32 -1.442695, %v297_v33  ;;  %v434_v44 = vadd.f32 %v1028_v17, %v433_v34 }
  0xd4   :  { %v1332_v41 = vpop.eup %1031  ;;  %v1334_v45 = vadd.f32 1.0, %v1030_v42 }
  0xd5   :  { %1037 = vpow2.f32 %v933_v36  ;;  %v438_v48 = vsel %vm437_vm2, %v1028_v17, %v434_v44  ;;  %v446_v49 = vmul.f32 %v1332_v41, %v1302_v18  ;;  %v1034_v57 = vpop.eup %1033  ;;  %vm451_vm4 = vweird.f32 %v1332_v41 }
  0xd6   :  { %1039 = vrcp.f32 %v1334_v45  ;;  %v249_v50 = vpop.f32.mrf.mxu0  ;;  %v443_v52 = vsel %vm440_vm3, %v442_v47, %v438_v48  ;;  %v1345_v59 = vadd.f32 1.0, %v1034_v57  ;;  %v469_v9 = vand.u32 2147483647, %v1334_v45  ;;  %vm1366_vm6 = vmor %vm450_vm5, %vm451_vm4 }
  0xd7   :  { %v250_v53 = vadd.f32 %v1256_v4, %v249_v50  ;;  %v626_v55 = vpack.c.bf16 %v443_v52, %v428_v51  ;;  %v447_v56 = vsub.f32 1.0, %v446_v49  ;;  %v471_v14 = vand.u32 2147483648, %v1334_v45 }
  0xd8   :  { %v1036_v61 = vpop.eup %1035  ;;  %1041 = vrcp.f32 %v1345_v59  ;;  %vm465_vm9 = vweird.f32 %v1334_v45  ;;  %vm1385_vm10 = vcmp.eq.f32.partialorder %v469_v9, 8.507059e+37  ;;  %vm600_vm12 = vweird.f32 %v1345_v59 }
  0xd9   :  { %v299_v58 = vadd.f32 %v1281_v54, %v250_v53  ;;  %956 = vmatmul.msk.bf16.gmra.mxu2 %vm665_vm11, %v626_v55  ;;  %v448_v60 = vmul.f32 %v1332_v41, %v447_v56  ;;  %v1354_v5 = vadd.f32 1.0, %v1036_v61  ;;  %v472_v28 = vor.u32 1.1754944e-38, %v471_v14 }
  0xda   :  { %v606_v32 = vand.u32 2147483648, %v1345_v59  ;;  %v604_v51 = vand.u32 2147483647, %v1345_v59 }
  0xdb   :  { %v1348_v62 = vpop.f32.mrf.mxu1  ;;  %v1038_v63 = vpop.eup %1037  ;;  %v934_v0 = vmul.f32 -1.442695, %v299_v58  ;;  %v449_v54 = vadd.f32 %v1332_v41, %v448_v60  ;;  %v621_v49 = vand.u32 2147483648, %v1354_v5  ;;  %vm615_vm1 = vweird.f32 %v1354_v5 }
  0xdc   :  { %v1040_v1 = vpop.eup %1039  ;;  %v1351_v2 = vadd.f32 1.0, %v1038_v63  ;;  %v607_v47 = vor.u32 1.1754944e-38, %v606_v32  ;;  %v619_v55 = vand.u32 2147483647, %v1354_v5  ;;  %vm605_vm4 = vcmp.eq.f32.partialorder %v604_v51, 8.507059e+37 }
  0xdd   :  { %1043 = vpow2.f32 %v934_v0  ;;  %v461_v6 = vmul.f32 %v1040_v1, %v1334_v45  ;;  %v453_v19 = vsel %vm1366_vm6, %v1332_v41, %v449_v54  ;;  %vm466_vm8 = vweird.f32 %v1040_v1 }
  0xde   :  { %1045 = vrcp.f32 %v1351_v2  ;;  %v252_v7 = vpop.f32.mrf.mxu0  ;;  %v1374_v17 = vpop.eup %1041  ;;  %v458_v33 = vsel %vm1370_vm7, %v457_v24, %v453_v19  ;;  %vm467_vm13 = vmor %vm465_vm9, %vm466_vm8  ;;  %vm480_vm0 = vweird.f32 %v1351_v2  ;;  %v484_v60 = vand.u32 2147483647, %v1351_v2 }
  0xdf   :  { %v253_v10 = vadd.f32 %v1256_v4, %v252_v7  ;;  %v462_v12 = vsub.f32 1.0, %v461_v6  ;;  %1047 = vrcp.f32 %v1354_v5  ;;  %v596_v23 = vmul.f32 %v1374_v17, %v1345_v59 }
  0xe0   :  { %vm601_vm14 = vweird.f32 %v1374_v17  ;;  %v622_v0 = vor.u32 1.1754944e-38, %v621_v49  ;;  %v486_v8 = vand.u32 2147483648, %v1351_v2  ;;  %vm620_vm6 = vcmp.eq.f32.partialorder %v619_v55, 8.507059e+37 }
  0xe1   :  { %v302_v18 = vadd.f32 %v1298_v11, %v253_v10  ;;  %v463_v20 = vmul.f32 %v1040_v1, %v462_v12  ;;  %v597_v31 = vsub.f32 1.0, %v596_v23  ;;  %vm1416_vm15 = vmor %vm600_vm12, %vm601_vm14  ;;  %vm1459_vm9 = vcmp.eq.f32.partialorder %v484_v60, 8.507059e+37 }
  0xe2   :  { %v487_v32 = vor.u32 1.1754944e-38, %v486_v8 }
  0xe3   :  { %v1380_v21 = vpop.f32.mrf.mxu1  ;;  %v1044_v26 = vpop.eup %1043  ;;  %v935_v11 = vmul.f32 -1.442695, %v302_v18  ;;  %v464_v27 = vadd.f32 %v1040_v1, %v463_v20  ;;  %v598_v39 = vmul.f32 %v1374_v17, %v597_v31 }
  0xe4   :  { %v1390_v29 = vpop.eup %1045  ;;  %v1392_v30 = vadd.f32 1.0, %v1044_v26 }
  0xe5   :  { %v1048_v34 = vpop.eup %1047  ;;  %1049 = vpow2.f32 %v935_v11  ;;  %v468_v35 = vsel %vm467_vm13, %v1040_v1, %v464_v27  ;;  %v476_v38 = vmul.f32 %v1390_v29, %v1351_v2  ;;  %v599_v22 = vadd.f32 %v1374_v17, %v598_v39 }
  0xe6   :  { %1051 = vrcp.f32 %v1392_v30  ;;  %v254_v40 = vpop.f32.mrf.mxu0  ;;  %v473_v42 = vsel %vm1385_vm10, %v472_v28, %v468_v35  ;;  %v611_v36 = vmul.f32 %v1048_v34, %v1354_v5  ;;  %vm616_vm2 = vweird.f32 %v1048_v34 }
  0xe7   :  { %v255_v44 = vadd.f32 %v1256_v4, %v254_v40  ;;  %v627_v41 = vpack.c.bf16 %v473_v42, %v458_v33  ;;  %v477_v45 = vsub.f32 1.0, %v476_v38  ;;  %v603_v59 = vsel %vm1416_vm15, %v1374_v17, %v599_v22  ;;  %vm1436_vm3 = vmor %vm615_vm1, %vm616_vm2 }
  0xe8   :  { %v612_v48 = vsub.f32 1.0, %v611_v36  ;;  %vm481_vm5 = vweird.f32 %v1390_v29  ;;  %v499_v12 = vand.u32 2147483647, %v1392_v30  ;;  %v501_v14 = vand.u32 2147483648, %v1392_v30 }
  0xe9   :  { %v304_v13 = vadd.f32 %v1316_v37, %v255_v44  ;;  %957 = vmatmul.msk.bf16.gmra.mxu2 %vm665_vm11, %v627_v41  ;;  %v478_v37 = vmul.f32 %v1390_v29, %v477_v45  ;;  %v608_v15 = vsel %vm605_vm4, %v607_v47, %v603_v59  ;;  %vm1455_vm8 = vmor %vm480_vm0, %vm481_vm5  ;;  %vm495_vm10 = vweird.f32 %v1392_v30 }
  0xea   :  { %v613_v53 = vmul.f32 %v1048_v34, %v612_v48  ;;  %vm500_vm13 = vcmp.eq.f32.partialorder %v499_v12, 8.507059e+37  ;;  %v502_v33 = vor.u32 1.1754944e-38, %v501_v14 }
  0xeb   :  { %v311_v52 = vpop.f32.mrf.mxu1  ;;  %v1050_v56 = vpop.eup %1049  ;;  %v936_v57 = vmul.f32 -1.442695, %v304_v13  ;;  %v479_v5 = vadd.f32 %v1390_v29, %v478_v37 }
  0xec   :  { %v312_v58 = vadd.f32 %v311_v52, %v263_v43  ;;  %v1052_v61 = vpop.eup %1051  ;;  %v1429_v63 = vadd.f32 1.0, %v1050_v56  ;;  %v614_v1 = vadd.f32 %v1048_v34, %v613_v53 }
  0xed   :  { %1053 = vpow2.f32 %v936_v57  ;;  %v491_v6 = vmul.f32 %v1052_v61, %v1392_v30  ;;  %vm496_vm7 = vweird.f32 %v1052_v61  ;;  %v483_v27 = vsel %vm1455_vm8, %v1390_v29, %v479_v5 }
  0xee   :  { %v939_v3 = vmul.f32 -1.442695, %v312_v58  ;;  %1055 = vrcp.f32 %v1429_v63  ;;  %v257_v7 = vpop.f32.mrf.mxu0  ;;  %v618_v16 = vsel %vm1436_vm3, %v1048_v34, %v614_v1  ;;  %vm497_vm12 = vmor %vm495_vm10, %vm496_vm7  ;;  %v488_v40 = vsel %vm1459_vm9, %v487_v32, %v483_v27 }
  0xef   :  { %v258_v9 = vadd.f32 %v1256_v4, %v257_v7  ;;  %v492_v10 = vsub.f32 1.0, %v491_v6  ;;  %v623_v19 = vsel %vm620_vm6, %v622_v0, %v618_v16  ;;  %vm510_vm14 = vweird.f32 %v1429_v63 }
  0xf0   :  { %1057 = vpow2.f32 %v939_v3  ;;  %v632_v25 = vpack.c.bf16 %v623_v19, %v608_v15  ;;  %v514_v53 = vand.u32 2147483647, %v1429_v63  ;;  %v516_v55 = vand.u32 2147483648, %v1429_v63 }
  0xf1   :  { %v307_v17 = vadd.f32 %v1348_v62, %v258_v9  ;;  %v493_v18 = vmul.f32 %v1052_v61, %v492_v10 }
  0xf2   :  { %962 = vmatmul.msk.bf16.vlgmr.msra.gmra.mxu3 %vm665_vm11, %v632_v25  ;;  %vm515_vm3 = vcmp.eq.f32.partialorder %v514_v53, 8.507059e+37 }
  0xf3   :  { %v313_v20 = vpop.f32.mrf.mxu1  ;;  %v1054_v62 = vpop.eup %1053  ;;  %v937_v26 = vmul.f32 -1.442695, %v307_v17  ;;  %v494_v28 = vadd.f32 %v1052_v61, %v493_v18 }
  0xf4   :  { %v314_v11 = vadd.f32 %v313_v20, %v265_v46  ;;  %v1467_v2 = vpop.eup %1055  ;;  %v378_v31 = vadd.f32 1.0, %v1054_v62 }
  0xf5   :  { %1059 = vpow2.f32 %v937_v26  ;;  %v498_v35 = vsel %vm497_vm12, %v1052_v61, %v494_v28  ;;  %v506_v38 = vmul.f32 %v1467_v2, %v1429_v63  ;;  %vm511_vm15 = vweird.f32 %v1467_v2 }
  0xf6   :  { %v1058_v30 = vpop.eup %1057  ;;  %v940_v34 = vmul.f32 -1.442695, %v314_v11  ;;  %1061 = vrcp.f32 %v378_v31  ;;  %v259_v39 = vpop.f32.mrf.mxu0  ;;  %v503_v42 = vsel %vm500_vm13, %v502_v33, %v498_v35  ;;  %v531_v56 = vand.u32 2147483648, %v378_v31  ;;  %vm1494_vm1 = vmor %vm510_vm14, %vm511_vm15  ;;  %v788_v11 = vld [vmem:[%s1566_s5 + $0x4] sm:$0x1] }
  0xf7   :  { %v1473_v29 = vadd.f32 1.0, %v1058_v30  ;;  %v260_v36 = vadd.f32 %v1256_v4, %v259_v39  ;;  %v628_v43 = vpack.c.bf16 %v503_v42, %v488_v40  ;;  %v507_v44 = vsub.f32 1.0, %v506_v38 }
  0xf8   :  { %1063 = vpow2.f32 %v940_v34  ;;  %v529_v58 = vand.u32 2147483647, %v378_v31  ;;  %vm525_vm2 = vweird.f32 %v378_v31  ;;  %v517_v63 = vor.u32 1.1754944e-38, %v516_v55 }
  0xf9   :  { %1065 = vrcp.f32 %v1473_v29  ;;  %v309_v41 = vadd.f32 %v1380_v21, %v260_v36  ;;  %958 = vmatmul.msk.bf16.gmra.mxu2 %vm665_vm11, %v628_v43  ;;  %v508_v47 = vmul.f32 %v1467_v2, %v507_v44  ;;  %v532_v54 = vor.u32 1.1754944e-38, %v531_v56 }
  0xfa   :  { %vm530_vm5 = vcmp.eq.f32.partialorder %v529_v58, 8.507059e+37  ;;  %v574_v16 = vand.u32 2147483647, %v1473_v29  ;;  %v576_v17 = vand.u32 2147483648, %v1473_v29  ;;  %vm570_vm6 = vweird.f32 %v1473_v29 }
  0xfb   :  { %v1060_v45 = vpop.eup %1059  ;;  %v938_v46 = vmul.f32 -1.442695, %v309_v41  ;;  %v509_v51 = vadd.f32 %v1467_v2, %v508_v47 }
  0xfc   :  { %v1062_v48 = vpop.eup %1061  ;;  %v1482_v49 = vadd.f32 1.0, %v1060_v45  ;;  %vm1520_vm10 = vcmp.eq.f32.partialorder %v574_v16, 8.507059e+37  ;;  %v577_v27 = vor.u32 1.1754944e-38, %v576_v17 }
  0xfd   :  { %1067 = vpow2.f32 %v938_v46  ;;  %v521_v13 = vmul.f32 %v1062_v48, %v378_v31  ;;  %vm526_vm0 = vweird.f32 %v1062_v48  ;;  %v513_v0 = vsel %vm1494_vm1, %v1467_v2, %v509_v51 }
  0xfe   :  { %v1064_v50 = vpop.eup %1063  ;;  %1069 = vrcp.f32 %v1482_v49  ;;  %vm527_vm4 = vmor %vm525_vm2, %vm526_vm0  ;;  %v518_v5 = vsel %vm515_vm3, %v517_v63, %v513_v0  ;;  %vm540_vm13 = vweird.f32 %v1482_v49  ;;  %v544_v32 = vand.u32 2147483647, %v1482_v49 }
  0xff   :  { %v1484_v22 = vpop.eup %1065  ;;  %v382_v4 = vadd.f32 1.0, %v1064_v50  ;;  %v522_v52 = vsub.f32 1.0, %v521_v13  ;;  %v546_v38 = vand.u32 2147483648, %v1482_v49 }
 0x100   :  { %v566_v21 = vmul.f32 %v1484_v22, %v1473_v29  ;;  %vm571_vm7 = vweird.f32 %v1484_v22 }
 0x101   :  { %1071 = vrcp.f32 %v382_v4  ;;  %v523_v57 = vmul.f32 %v1062_v48, %v522_v52  ;;  %v589_v20 = vand.u32 2147483647, %v382_v4  ;;  %v591_v23 = vand.u32 2147483648, %v382_v4  ;;  %vm1516_vm9 = vmor %vm570_vm6, %vm571_vm7 }
 0x102   :  { %v567_v37 = vsub.f32 1.0, %v566_v21  ;;  %vm585_vm12 = vweird.f32 %v382_v4  ;;  %v547_v45 = vor.u32 1.1754944e-38, %v546_v38  ;;  %vm797_vm7 = vcmask 1041408  }
 0x103   :  { %v1068_v61 = vpop.eup %1067  ;;  %v524_v59 = vadd.f32 %v1062_v48, %v523_v57  ;;  %vm590_vm15 = vcmp.eq.f32.partialorder %v589_v20, 8.507059e+37  ;;  %v592_v33 = vor.u32 1.1754944e-38, %v591_v23  ;;  %v780_v20 = vlaneseq  ;;  %v787_v23 = vld [vmem:[%s1566_s5] sm:$0xf] }
 0x104   :  { %v1501_v1 = vpop.eup %1069  ;;  %v1503_v3 = vadd.f32 1.0, %v1068_v61  ;;  %v568_v8 = vmul.f32 %v1484_v22, %v567_v37  ;;  %v789_v26 = vunpack.c.l.bf16 %v787_v23 }
 0x105   :  { %v528_v6 = vsel %vm527_vm4, %v1062_v48, %v524_v59  ;;  %v536_v7 = vmul.f32 %v1501_v1, %v1482_v49  ;;  %vm541_vm0 = vweird.f32 %v1501_v1  ;;  %v1010_v49 = vld [vmem:[%s1565_s4] ss:$0 sm:$0xff] }
 0x106   :  { %1073 = vrcp.f32 %v1503_v3  ;;  %v533_v10 = vsel %vm530_vm5, %v532_v54, %v528_v6  ;;  %v569_v18 = vadd.f32 %v1484_v22, %v568_v8  ;;  %v561_v29 = vand.u32 2147483648, %v1503_v3  ;;  %vm542_vm2 = vmor %vm540_vm13, %vm541_vm0 }
 0x107   :  { %v1072_v9 = vpop.eup %1071  ;;  %v629_v14 = vpack.c.bf16 %v533_v10, %v518_v5  ;;  %v537_v15 = vsub.f32 1.0, %v536_v7  ;;  %v559_v36 = vand.u32 2147483647, %v1503_v3  ;;  %vm555_vm3 = vweird.f32 %v1503_v3 }
 0x108   :  { %v581_v12 = vmul.f32 %v1072_v9, %v382_v4  ;;  %vm586_vm8 = vweird.f32 %v1072_v9  ;;  %v573_v2 = vsel %vm1516_vm9, %v1484_v22, %v569_v18  ;;  %v562_v46 = vor.u32 1.1754944e-38, %v561_v29 }
 0x109   :  { %959 = vmatmul.msk.bf16.gmra.mxu2 %vm665_vm11, %v629_v14  ;;  %v538_v24 = vmul.f32 %v1501_v1, %v537_v15  ;;  %vm587_vm14 = vmor %vm585_vm12, %vm586_vm8  ;;  %v578_v39 = vsel %vm1520_vm10, %v577_v27, %v573_v2  ;;  %vm545_vm5 = vcmp.eq.f32.partialorder %v544_v32, 8.507059e+37  ;;  %vm560_vm6 = vcmp.eq.f32.partialorder %v559_v36, 8.507059e+37 }
 0x10a   :  { %v582_v19 = vsub.f32 1.0, %v581_v12  ;;  %v790_v27 = vunpack.c.l.bf16 %v788_v11  ;;  %v1075_v2 = vmov 0.0  }
 0x10b   :  { %v539_v30 = vadd.f32 %v1501_v1, %v538_v24 }
 0x10c   :  { %v583_v25 = vmul.f32 %v1072_v9, %v582_v19  ;;  %v1074_v62 = vpop.eup %1073 }
 0x10d   :  { %v551_v28 = vmul.f32 %v1074_v62, %v1503_v3  ;;  %vm556_vm1 = vweird.f32 %v1074_v62  ;;  %v543_v44 = vsel %vm542_vm2, %v1501_v1, %v539_v30 }
 0x10e   :  { %v584_v31 = vadd.f32 %v1072_v9, %v583_v25  ;;  %vm557_vm4 = vmor %vm555_vm3, %vm556_vm1  ;;  %v548_v48 = vsel %vm545_vm5, %v547_v45, %v543_v44  ;;  %v781_v25 = vand.u32 127, %v780_v20 }
 0x10f   :  { %v552_v34 = vsub.f32 1.0, %v551_v28 }
 0x110   :  { %v588_v35 = vsel %vm587_vm14, %v1072_v9, %v584_v31 }
 0x111   :  { %v593_v40 = vsel %vm590_vm15, %v592_v33, %v588_v35  ;;  %v553_v42 = vmul.f32 %v1074_v62, %v552_v34 }
 0x112   :  { %v631_v43 = vpack.c.bf16 %v593_v40, %v578_v39 }
 0x113   :  { %v554_v41 = vadd.f32 %v1074_v62, %v553_v42 }
 0x115   :  { %v558_v47 = vsel %vm557_vm4, %v1074_v62, %v554_v41 }
 0x116   :  { %v563_v50 = vsel %vm560_vm6, %v562_v46, %v558_v47 }
 0x117   :  { %v630_v13 = vpack.c.bf16 %v563_v50, %v548_v48 }
 0x119   :  { %960 = vmatmul.msk.bf16.gmra.mxu2 %vm665_vm11, %v630_v13 }
 0x129   :  { %961 = vmatmul.msk.bf16.gmra.mxu2 %vm665_vm11, %v631_v43  ;;  %vm784_vm11 = vcmp.lt.s32.totalorder %v781_v25, 8 }
 0x12a   :  { %v963_v31 = vsel %vm784_vm11, 1.0, %v1075_v2 }
 0x14c   :  { %v703_v22 = vpop.f32.mrf.mxu2 }
 0x14d   :  { %v704_v4 = vadd.f32 %v1010_v49, %v703_v22 }
 0x14f   :  { %743 = vxpose.xlu0.b32.start [1/16] (narrow) %v704_v4, 16 }
 0x154   :  { %v705_v21 = vpop.f32.mrf.mxu2 }
 0x155   :  { %v706_v51 = vadd.f32 %v1010_v49, %v705_v21 }
 0x157   :  { %744 = vxpose.xlu0.b32.cont [2/16] (narrow) %v706_v51, 16 }
 0x15c   :  { %v708_v52 = vpop.f32.mrf.mxu2 }
 0x15d   :  { %v709_v53 = vadd.f32 %v1010_v49, %v708_v52 }
 0x15f   :  { %745 = vxpose.xlu0.b32.cont [3/16] (narrow) %v709_v53, 16 }
 0x164   :  { %v710_v55 = vpop.f32.mrf.mxu2 }
 0x165   :  { %v711_v56 = vadd.f32 %v1010_v49, %v710_v55 }
 0x167   :  { %746 = vxpose.xlu0.b32.cont [4/16] (narrow) %v711_v56, 16 }
 0x16c   :  { %v713_v57 = vpop.f32.mrf.mxu2 }
 0x16d   :  { %v714_v58 = vadd.f32 %v1010_v49, %v713_v57 }
 0x16f   :  { %747 = vxpose.xlu0.b32.cont [5/16] (narrow) %v714_v58, 16 }
 0x174   :  { %v715_v37 = vpop.f32.mrf.mxu2 }
 0x175   :  { %v716_v60 = vadd.f32 %v1010_v49, %v715_v37  ;;  %v738_v16 = vpop.f32.mrf.mxu3 }
 0x176   :  { %v739_v17 = vadd.f32 %v1010_v49, %v738_v16 }
 0x177   :  { %748 = vxpose.xlu0.b32.cont [6/16] (narrow) %v716_v60, 16 }
 0x17c   :  { %v718_v61 = vpop.f32.mrf.mxu2 }
 0x17d   :  { %v719_v0 = vadd.f32 %v1010_v49, %v718_v61  ;;  %v740_v18 = vpop.f32.mrf.mxu3 }
 0x17e   :  { %v741_v19 = vadd.f32 %v1010_v49, %v740_v18 }
 0x17f   :  { %749 = vxpose.xlu0.b32.cont [7/16] (narrow) %v719_v0, 16 }
 0x184   :  { %v720_v59 = vpop.f32.mrf.mxu2 }
 0x185   :  { %v721_v1 = vadd.f32 %v1010_v49, %v720_v59 }
 0x187   :  { %750 = vxpose.xlu0.b32.cont [8/16] (narrow) %v721_v1, 16 }
 0x18c   :  { %v723_v3 = vpop.f32.mrf.mxu2 }
 0x18d   :  { %v724_v63 = vadd.f32 %v1010_v49, %v723_v3 }
 0x18f   :  { %751 = vxpose.xlu0.b32.cont [9/16] (narrow) %v724_v63, 16 }
 0x194   :  { %v725_v54 = vpop.f32.mrf.mxu2 }
 0x195   :  { %v726_v6 = vadd.f32 %v1010_v49, %v725_v54 }
 0x197   :  { %752 = vxpose.xlu0.b32.cont [10/16] (narrow) %v726_v6, 16 }
 0x19c   :  { %v728_v7 = vpop.f32.mrf.mxu2 }
 0x19d   :  { %v729_v8 = vadd.f32 %v1010_v49, %v728_v7 }
 0x19f   :  { %753 = vxpose.xlu0.b32.cont [11/16] (narrow) %v729_v8, 16 }
 0x1a4   :  { %v730_v9 = vpop.f32.mrf.mxu2 }
 0x1a5   :  { %v731_v5 = vadd.f32 %v1010_v49, %v730_v9 }
 0x1a7   :  { %754 = vxpose.xlu0.b32.cont [12/16] (narrow) %v731_v5, 16 }
 0x1ac   :  { %v733_v10 = vpop.f32.mrf.mxu2 }
 0x1ad   :  { %v734_v12 = vadd.f32 %v1010_v49, %v733_v10 }
 0x1af   :  { %755 = vxpose.xlu0.b32.cont [13/16] (narrow) %v734_v12, 16 }
 0x1b4   :  { %v735_v14 = vpop.f32.mrf.mxu2 }
 0x1b5   :  { %v736_v15 = vadd.f32 %v1010_v49, %v735_v14 }
 0x1b7   :  { %756 = vxpose.xlu0.b32.cont [14/16] (narrow) %v736_v15, 16 }
 0x1bf   :  { %757 = vxpose.xlu0.b32.cont [15/16] (narrow) %v739_v17, 16 }
 0x1c7   :  { %758 = vxpose.xlu0.b32.end [16/16] (narrow) %v741_v19, 16 }
 0x1f3   :  { %v759_v24 = vpop.trf.xlu0 }
 0x1f4   :  { %v775_v62 = vpack.c.bf16 %v759_v24, %v759_v24  ;;  %v791_v28 = vsub.f32 %v759_v24, %v789_v26 }
 0x1f6   :  { %777 = vst [vmem:[%s1567_s6] sm:$0xf] %v775_v62  ;;  %v793_v34 = vmul.f32 %v963_v31, %v791_v28 }
 0x1f8   :  { %v795_v29 = vmul.f32 %v793_v34, %v793_v34 }
 0x1fb   :  { %v760_v32 = vpop.trf.xlu0 }
 0x1fc   :  { %v776_v33 = vpack.c.bf16 %v760_v32, %v760_v32  ;;  %v792_v30 = vsub.f32 %v760_v32, %v790_v27 }
 0x1fe   :  { %778 = vst [vmem:[%s1567_s6 + $0x4] sm:$0x1] %v776_v33  ;;  %v794_v35 = vmul.f32 %v963_v31, %v792_v30 }
 0x200   :  { %v796_v38 = vmul.f32 %v794_v35, %v794_v35 }
 0x202   :  { %v798_v39 = vsel %vm797_vm7, %v796_v38, 0.0 }
 0x203   :  { %v799_v40 = vadd.f32 %v798_v39, %v795_v29 }
 0x205   :  { %800 = vadd.xlane.f32.xlu1 %v799_v40 }
 0x278   :  { %v801_v42 = vpop.xlane.xlu1 %800 }
 0x279   :  { %v802_v36 = vrot.slane %v801_v42, 4 }
 0x27b   :  { %v803_v43 = vadd.f32 %v802_v36, %v801_v42 }
 0x27d   :  { %v804_v44 = vrot.slane %v803_v43, 2 }
 0x27f   :  { %v805_v41 = vadd.f32 %v804_v44, %v803_v43 }
 0x281   :  { %v806_v45 = vrot.slane %v805_v41, 1 }
 0x283   :  { %v807_v46 = vadd.f32 %v806_v45, %v805_v41 }
 0x285   :  { %1006 = vpush %v807_v46 }
 0x2b6   :  { %s1007_s5 = spop %1006 }
 0x2b7   :  { %v809_v47 = vstv %s1007_s5 }
 0x2b8   :  { %810 = vst [vmem:[%s1568_s7] sm:$0xff] %v809_v47 }

</bundles_post_ra>
